<compile_context>
chip_gen: v7x
topology: tpu7x:2x2x1
jax: 0.10.0
libtpu: 0.0.40
codegen_flags: <defaults>
</compile_context>

<pallas_src>
import jax
import jax.numpy as jnp
import numpy as np
from jax.experimental import pallas as pl
from jax.experimental.pallas import tpu as pltpu


def _ru(x, m):
  return ((x + m - 1) // m) * m


# ---------------------------------------------------------------------------
# Stage 1: fused recurrent decode kernel (one launch for all T steps).
# ---------------------------------------------------------------------------
def decoder_recurrent_kernel(
    gi_emb_ref,   # [1, B, 3H] f32  per-step GRU input from embedding (+ b_ih)
    hid0_ref,     # [B, H]     f32  initial hidden
    enc_ref,      # [B, S, ENC2]    encoder outputs (storage dtype)
    eproj_ref,    # [B, S, HdP] f32 hoisted enc @ w_attn_e + b_attn (lane-pad)
    mask_ref,     # [B, S]     f32  1.0 valid / 0.0 pad (binary mask assumed)
    w_hid_ref,    # [H, HdP+3H]     [w_attn_h | 0 pad | w_hh^T]
    w_wgt_ref,    # [ENC2, 3H]      GRU input weights for the context vector
    v_ref,        # [1, HdP]   f32  attention scorer v (zero padded)
    bhh_ref,      # [1, 3H]    f32  GRU hidden bias
    out_ref,      # [T, B, PAD] f32 T-resident packed: [h_new | weighted | attn]
    h_scr,        # VMEM [B, H] f32 hidden state carried across grid steps
):
  t = pl.program_id(0)
  B, H = h_scr.shape
  S = mask_ref.shape[1]
  ENC2 = enc_ref.shape[2]
  HdP = v_ref.shape[1]
  OFF_W = _ru(H, 128)
  OFF_A = OFF_W + _ru(ENC2, 128)

  @pl.when(t == 0)
  def _():
    h_scr[...] = hid0_ref[...]

  hid = h_scr[...]                                         # f32 [B, H]
  wdt = w_hid_ref.dtype

  # --- hidden-side fused matmul: [attention h-projection | GRU gh gates] ---
  hid_proj = jnp.dot(hid.astype(wdt), w_hid_ref[...],
                     preferred_element_type=jnp.float32)   # [B, HdP+3H]
  h_proj = hid_proj[:, :HdP]
  gh = hid_proj[:, HdP:] + bhh_ref[...]                    # [B, 3H]

  # --- attention (encoder projection hoisted out of the recurrence) ---
  energy = jnp.tanh(eproj_ref[...] + h_proj[:, None, :])   # [B, S, HdP]
  scores = jnp.sum(energy * v_ref[...][None], axis=-1)     # [B, S]
  scores = jnp.where(mask_ref[...] < 0.5, -1e10, scores)
  scores = scores - jnp.max(scores, axis=-1, keepdims=True)
  ex = jnp.exp(scores)
  attn = ex / jnp.sum(ex, axis=-1, keepdims=True)          # exact softmax

  # --- weighted context on the MXU: [B,1,S] @ [B,S,ENC2] -> [B,ENC2] ---
  enc = enc_ref[...]
  weighted = jnp.einsum('bqs,bse->bqe',
                        attn[:, None, :].astype(enc.dtype), enc,
                        preferred_element_type=jnp.float32)[:, 0, :]

  # --- GRU cell (PyTorch gate order r, z, n); embedding part precomputed ---
  gi = gi_emb_ref[0] + jnp.dot(weighted.astype(wdt), w_wgt_ref[...],
                               preferred_element_type=jnp.float32)
  r = jax.nn.sigmoid(gi[:, :H] + gh[:, :H])
  z = jax.nn.sigmoid(gi[:, H:2 * H] + gh[:, H:2 * H])
  n = jnp.tanh(gi[:, 2 * H:] + r * gh[:, 2 * H:])
  h_new = (1.0 - z) * n + z * hid                          # [B, H]

  h_scr[...] = h_new

  # --- T-resident packed output, 128-lane aligned segments (one flush) ---
  out_ref[pl.ds(t, 1), :, 0:H] = h_new[None]
  out_ref[pl.ds(t, 1), :, OFF_W:OFF_W + ENC2] = weighted[None]
  out_ref[pl.ds(t, 1), :, OFF_A:OFF_A + S] = attn[None]


# ---------------------------------------------------------------------------
# Stage 2: batched fc_out over all T*B rows, V-tiled parallel grid.
# ---------------------------------------------------------------------------
def fc_out_kernel(x_ref, w_ref, b_ref, o_ref):
  o_ref[...] = (jnp.dot(x_ref[...].astype(w_ref.dtype), w_ref[...],
                        preferred_element_type=jnp.float32) + b_ref[...])


# ---------------------------------------------------------------------------
# Wrapper
# ---------------------------------------------------------------------------
def decoder_decode(input_ids, hidden0, enc, mask, emb_table, params,
                   *, param_dtype=jnp.float32):
  """Fused T-step decode (teacher forcing). T=1 reproduces Decoder.forward."""
  f32 = jnp.float32
  T, B = input_ids.shape
  _, S, ENC2 = enc.shape
  H = hidden0.shape[1]
  E = emb_table.shape[1]
  Hd = params['w_attn_h'].shape[1]
  V = params['w_fc'].shape[1]

  HdP = _ru(Hd, 128)
  OFF_W = _ru(H, 128)
  OFF_A = OFF_W + _ru(ENC2, 128)
  PAD = _ru(OFF_A + S, 128)

  enc = enc.astype(f32)
  hidden0 = hidden0.astype(f32)
  mask = mask.astype(f32)

  # --- one-time precompute (out of the recurrence), plain XLA --------------
  ids = jnp.clip(input_ids.astype(jnp.int32), 0, emb_table.shape[0] - 1)
  emb = jnp.take(emb_table.astype(f32), ids, axis=0)               # [T, B, E]
  e_proj = jnp.einsum('bse,eh->bsh', enc, params['w_attn_e'].astype(f32))
  e_proj = e_proj + params['b_attn'].astype(f32)[None]
  e_projb = jnp.zeros((B, S, HdP), f32).at[:, :, :Hd].set(e_proj)  # lane-pad
  gi_emb = (emb.reshape(T * B, E) @ params['w_ih_t'][:E].astype(f32)
            + params['b_ih'].astype(f32)).reshape(T, B, 3 * H)

  # --- pack weights once (128-lane aligned, no in-kernel concats) ----------
  w_hid = jnp.zeros((H, HdP + 3 * H), f32)
  w_hid = w_hid.at[:, :Hd].set(params['w_attn_h'].astype(f32))
  w_hid = w_hid.at[:, HdP:].set(params['w_hh_t'].astype(f32))
  w_hid = w_hid.astype(param_dtype)
  w_wgt = params['w_ih_t'][E:].astype(param_dtype)                 # [ENC2, 3H]
  v_pad = jnp.zeros((1, HdP), f32).at[:, :Hd].set(params['v'].astype(f32))
  b_hh = params['b_hh'].astype(f32)
  enc_c = enc.astype(param_dtype)

  def resident(arr):   # full block, constant index -> DMA'd once, VMEM resident
    nd = arr.ndim
    return pl.BlockSpec(tuple(arr.shape), lambda t, _nd=nd: (0,) * _nd)

  resident_bytes = sum(int(np.prod(a.shape)) * a.dtype.itemsize
                       for a in (hidden0, enc_c, e_projb, mask, w_hid, w_wgt,
                                 v_pad, b_hh))
  out_bytes = T * B * PAD * 4
  vmem_limit = int(min(64 * 1024 * 1024,
                       max(32 * 1024 * 1024,
                           2 * (resident_bytes + out_bytes) + 8 * 1024 * 1024)))

  grid_spec = pltpu.PrefetchScalarGridSpec(
      num_scalar_prefetch=0,
      grid=(T,),
      in_specs=[
          pl.BlockSpec((1, B, 3 * H), lambda t: (t, 0, 0)),   # per-step gi_emb
          resident(hidden0),
          resident(enc_c),
          resident(e_projb),
          resident(mask),
          resident(w_hid),
          resident(w_wgt),
          resident(v_pad),
          resident(b_hh),
      ],
      out_specs=pl.BlockSpec((T, B, PAD), lambda t: (0, 0, 0)),   # T-resident
      scratch_shapes=[pltpu.VMEM((B, H), jnp.float32)],
  )

  out = pl.pallas_call(
      decoder_recurrent_kernel,
      out_shape=jax.ShapeDtypeStruct((T, B, PAD), jnp.float32),
      grid_spec=grid_spec,
      compiler_params=pltpu.CompilerParams(
          dimension_semantics=("arbitrary",),     # time axis is a recurrence
          vmem_limit_bytes=vmem_limit),
  )(gi_emb, hidden0, enc_c, e_projb, mask, w_hid, w_wgt, v_pad, b_hh)

  h_all = out[:, :, 0:H]
  weighted_all = out[:, :, OFF_W:OFF_W + ENC2]
  attn = out[:, :, OFF_A:OFF_A + S]

  # --- stage 2: pred = [h_new | weighted | emb] @ w_fc + b_fc, batched -----
  K = H + ENC2 + E
  fc_in = jnp.concatenate([h_all, weighted_all, emb], axis=-1).reshape(T * B, K)
  rows = T * B
  RP = _ru(rows, 8)
  if RP != rows:
    fc_in = jnp.concatenate([fc_in, jnp.zeros((RP - rows, K), f32)], axis=0)
  tv = min(V, 512) if V % 128 == 0 else V
  w_fc = params['w_fc'].astype(param_dtype)
  b_fc = params['b_fc'].astype(f32)

  pred = pl.pallas_call(
      fc_out_kernel,
      out_shape=jax.ShapeDtypeStruct((RP, V), jnp.float32),
      grid=(pl.cdiv(V, tv),),
      in_specs=[
          pl.BlockSpec((RP, K), lambda j: (0, 0)),
          pl.BlockSpec((K, tv), lambda j: (0, j)),
          pl.BlockSpec((1, tv), lambda j: (0, j)),
      ],
      out_specs=pl.BlockSpec((RP, tv), lambda j: (0, j)),
      compiler_params=pltpu.CompilerParams(
          dimension_semantics=("parallel",)),     # vocab tiles are independent
  )(fc_in, w_fc, b_fc)

  pred = pred[:rows].reshape(T, B, V)
  return pred, h_all, attn


def decoder_step(input_id, hidden, enc, mask, emb_table, params, **kw):
  """Exact single-step equivalent of the PyTorch Decoder.forward."""
  pred, h_all, attn = decoder_decode(
      input_id[None, :], hidden, enc, mask, emb_table, params, **kw)
  return pred[0], h_all[0], attn[0]


def reference_decode(input_ids, hidden0, enc, mask, emb_table, params):
  """Pure-JAX mirror of the PyTorch Decoder.forward applied T times."""
  H = hidden0.shape[1]
  T = input_ids.shape[0]
  hid = hidden0
  preds, hs, attns = [], [], []
  for t in range(T):
    emb = emb_table[input_ids[t]]
    h_proj = hid @ params['w_attn_h']
    e_proj = jnp.einsum('bse,eh->bsh', enc, params['w_attn_e'])
    energy = jnp.tanh(e_proj + h_proj[:, None, :] + params['b_attn'][None])
    scores = jnp.sum(energy * params['v'][None], axis=-1)
    scores = jnp.where(mask == 0.0, -1e10, scores)
    a = jax.nn.softmax(scores, axis=-1)
    weighted = jnp.einsum('bs,bse->be', a, enc)
    x = jnp.concatenate([emb, weighted], axis=-1)
    gi = x @ params['w_ih_t'] + params['b_ih']
    gh = hid @ params['w_hh_t'] + params['b_hh']
    r = jax.nn.sigmoid(gi[:, :H] + gh[:, :H])
    z = jax.nn.sigmoid(gi[:, H:2 * H] + gh[:, H:2 * H])
    n = jnp.tanh(gi[:, 2 * H:] + r * gh[:, 2 * H:])
    h_new = (1.0 - z) * n + z * hid
    fc_in = jnp.concatenate([h_new, weighted, emb], axis=-1)
    pred = fc_in @ params['w_fc'] + params['b_fc']
    preds.append(pred); hs.append(h_new); attns.append(a)
    hid = h_new
  return jnp.stack(preds), jnp.stack(hs), jnp.stack(attns)


if __name__ == "__main__":
  T, B, S = 4, 2, 8
  output_dim, emb_dim, enc_hid_dim, dec_hid_dim = 64, 32, 16, 32
  ENC2 = 2 * enc_hid_dim

  key = jax.random.PRNGKey(0)
  ks = jax.random.split(key, 16)

  def init(k, shape, scale=0.1):
    return (scale * jax.random.normal(k, shape)).astype(jnp.float32)

  emb_table = init(ks[0], (output_dim, emb_dim))
  params = {
      'w_attn_h': init(ks[1], (dec_hid_dim, dec_hid_dim)),
      'w_attn_e': init(ks[2], (ENC2, dec_hid_dim)),
      'b_attn':   init(ks[3], (1, dec_hid_dim)),
      'v':        init(ks[4], (1, dec_hid_dim)),
      'w_ih_t':   init(ks[5], (ENC2 + emb_dim, 3 * dec_hid_dim)),
      'b_ih':     init(ks[6], (1, 3 * dec_hid_dim)),
      'w_hh_t':   init(ks[7], (dec_hid_dim, 3 * dec_hid_dim)),
      'b_hh':     init(ks[8], (1, 3 * dec_hid_dim)),
      'w_fc':     init(ks[9], (ENC2 + dec_hid_dim + emb_dim, output_dim)),
      'b_fc':     init(ks[10], (1, output_dim)),
  }

  input_ids = jax.random.randint(ks[11], (T, B), 0, output_dim)    # [T, B]
  hidden = init(ks[12], (B, dec_hid_dim), scale=0.5)               # [B, H]
  encoder_outputs = init(ks[13], (B, S, ENC2), scale=0.5)          # [B, S, 2E]
  mask = jnp.concatenate(                                          # binary mask
      [jnp.ones((1, S), jnp.float32),
       jnp.concatenate([jnp.ones((1, S - 2), jnp.float32),
                        jnp.zeros((1, 2), jnp.float32)], axis=1)], axis=0)

  pred_r, h_r, a_r = reference_decode(
      input_ids, hidden, encoder_outputs, mask, emb_table, params)

  # f32 storage: tight check
  pred, h_all, attn = decoder_decode(
      input_ids, hidden, encoder_outputs, mask, emb_table, params,
      param_dtype=jnp.float32)
  jax.block_until_ready((pred, h_all, attn))
  assert pred.shape == (T, B, output_dim)
  assert h_all.shape == (T, B, dec_hid_dim)
  assert attn.shape == (T, B, S)
  assert np.allclose(np.asarray(pred), np.asarray(pred_r), atol=2e-3, rtol=2e-3)
  assert np.allclose(np.asarray(h_all), np.asarray(h_r), atol=2e-3, rtol=2e-3)
  assert np.allclose(np.asarray(attn), np.asarray(a_r), atol=1e-3, rtol=1e-3)

  # bf16 weight/enc storage (v6e/v7x residency & MXU rate): loose check
  pred_b, h_b, a_b = decoder_decode(
      input_ids, hidden, encoder_outputs, mask, emb_table, params,
      param_dtype=jnp.bfloat16)
  jax.block_until_ready((pred_b, h_b, a_b))
  assert np.allclose(np.asarray(pred_b), np.asarray(pred_r), atol=5e-2, rtol=5e-2)
  assert np.allclose(np.asarray(h_b), np.asarray(h_r), atol=5e-2, rtol=5e-2)
  assert np.allclose(np.asarray(a_b), np.asarray(a_r), atol=3e-2, rtol=3e-2)

  # single-step API (exact module forward)
  p1, h1, a1 = decoder_step(
      input_ids[0], hidden, encoder_outputs, mask, emb_table, params)
  jax.block_until_ready((p1, h1, a1))
  assert np.allclose(np.asarray(p1), np.asarray(pred_r[0]), atol=2e-3, rtol=2e-3)
  assert np.allclose(np.asarray(h1), np.asarray(h_r[0]), atol=2e-3, rtol=2e-3)
  assert np.allclose(np.asarray(a1), np.asarray(a_r[0]), atol=1e-3, rtol=1e-3)

  print("KERNEL_OK")
</pallas_src>

<mosaic_0001>
module attributes {stable_mosaic.version = 11 : i64} {
  func.func @decoder_recurrent_kernel(%arg0: i32, %arg1: memref<1x2x96xf32, #tpu.memory_space<vmem>>, %arg2: memref<2x32xf32, #tpu.memory_space<vmem>>, %arg3: memref<2x8x32xf32, #tpu.memory_space<vmem>>, %arg4: memref<2x8x128xf32, #tpu.memory_space<vmem>>, %arg5: memref<2x8xf32, #tpu.memory_space<vmem>>, %arg6: memref<32x224xf32, #tpu.memory_space<vmem>>, %arg7: memref<32x96xf32, #tpu.memory_space<vmem>>, %arg8: memref<1x128xf32, #tpu.memory_space<vmem>>, %arg9: memref<1x96xf32, #tpu.memory_space<vmem>>, %arg10: memref<4x2x384xf32, #tpu.memory_space<vmem>>, %arg11: memref<2x32xf32, #tpu.memory_space<vmem>>) attributes {dimension_semantics = [#tpu.dimension_semantics<arbitrary>], iteration_bounds = array<i64: 4>, scalar_prefetch = 0 : i64, scratch_operands = 1 : i64, tpu.core_type = #tpu.core_type<tc>, window_params = [{transform_indices = @transform_0, window_bounds = array<i64: 1, 2, 96>}, {pipeline_mode = #tpu.pipeline_mode<synchronous>, transform_indices = @transform_1, window_bounds = array<i64: 2, 32>}, {pipeline_mode = #tpu.pipeline_mode<synchronous>, transform_indices = @transform_2, window_bounds = array<i64: 2, 8, 32>}, {pipeline_mode = #tpu.pipeline_mode<synchronous>, transform_indices = @transform_3, window_bounds = array<i64: 2, 8, 128>}, {pipeline_mode = #tpu.pipeline_mode<synchronous>, transform_indices = @transform_4, window_bounds = array<i64: 2, 8>}, {pipeline_mode = #tpu.pipeline_mode<synchronous>, transform_indices = @transform_5, window_bounds = array<i64: 32, 224>}, {pipeline_mode = #tpu.pipeline_mode<synchronous>, transform_indices = @transform_6, window_bounds = array<i64: 32, 96>}, {pipeline_mode = #tpu.pipeline_mode<synchronous>, transform_indices = @transform_7, window_bounds = array<i64: 1, 128>}, {pipeline_mode = #tpu.pipeline_mode<synchronous>, transform_indices = @transform_8, window_bounds = array<i64: 1, 96>}, {pipeline_mode = #tpu.pipeline_mode<synchronous>, transform_indices = @transform_9, window_bounds = array<i64: 4, 2, 384>}]} {
    %c0_i32 = arith.constant 0 : i32
    %0 = arith.cmpi eq, %arg0, %c0_i32 : i32
    %1 = arith.extui %0 : i1 to i32
    %c0_i32_0 = arith.constant 0 : i32
    %2 = arith.cmpi ne, %1, %c0_i32_0 : i32
    scf.if %2 {
      %c0_37 = arith.constant 0 : index
      %c0_38 = arith.constant 0 : index
      %80 = vector.load %arg2[%c0_37, %c0_38] : memref<2x32xf32, #tpu.memory_space<vmem>>, vector<2x32xf32>
      %c0_39 = arith.constant 0 : index
      %c0_40 = arith.constant 0 : index
      %81 = vector.load %arg11[%c0_39, %c0_40] : memref<2x32xf32, #tpu.memory_space<vmem>>, vector<2x32xf32>
      tpu.vector_store %arg11[%c0_39, %c0_40], %80 {strides = array<i32>} : memref<2x32xf32, #tpu.memory_space<vmem>>, vector<2x32xf32>,
    } else {
    }
    %c0 = arith.constant 0 : index
    %c0_1 = arith.constant 0 : index
    %3 = vector.load %arg11[%c0, %c0_1] : memref<2x32xf32, #tpu.memory_space<vmem>>, vector<2x32xf32>
    %c0_2 = arith.constant 0 : index
    %c0_3 = arith.constant 0 : index
    %4 = vector.load %arg6[%c0_2, %c0_3] : memref<32x224xf32, #tpu.memory_space<vmem>>, vector<32x224xf32>
    %cst = arith.constant dense<0.000000e+00> : vector<2x224xf32>
    %5 = tpu.matmul %3, %4, %cst {dimension_numbers = #tpu.dot_dimension_numbers<[1], [0], [0], [1], [0, 0, 1, 1], [], []>} : vector<2x32xf32>, vector<32x224xf32>, vector<2x224xf32> -> vector<2x224xf32>
    %6 = vector.extract_strided_slice %5 {offsets = [0, 0], sizes = [2, 128], strides = [1, 1]} : vector<2x224xf32> to vector<2x128xf32>
    %7 = vector.extract_strided_slice %5 {offsets = [0, 128], sizes = [2, 96], strides = [1, 1]} : vector<2x224xf32> to vector<2x96xf32>
    %c0_4 = arith.constant 0 : index
    %c0_5 = arith.constant 0 : index
    %8 = vector.load %arg9[%c0_4, %c0_5] : memref<1x96xf32, #tpu.memory_space<vmem>>, vector<1x96xf32>
    %9 = vector.broadcast %8 : vector<1x96xf32> to vector<2x96xf32>
    %10 = arith.addf %7, %9 : vector<2x96xf32>
    %c0_6 = arith.constant 0 : index
    %c0_7 = arith.constant 0 : index
    %c0_8 = arith.constant 0 : index
    %11 = vector.load %arg4[%c0_6, %c0_7, %c0_8] : memref<2x8x128xf32, #tpu.memory_space<vmem>>, vector<2x8x128xf32>
    %12 = vector.shape_cast %6 : vector<2x128xf32> to vector<2x1x128xf32>
    %13 = vector.broadcast %12 : vector<2x1x128xf32> to vector<2x8x128xf32>
    %14 = arith.addf %11, %13 : vector<2x8x128xf32>
    %15 = math.tanh %14 : vector<2x8x128xf32>
    %c0_9 = arith.constant 0 : index
    %c0_10 = arith.constant 0 : index
    %16 = vector.load %arg8[%c0_9, %c0_10] : memref<1x128xf32, #tpu.memory_space<vmem>>, vector<1x128xf32>
    %17 = vector.shape_cast %16 : vector<1x128xf32> to vector<1x1x128xf32>
    %18 = vector.broadcast %17 : vector<1x1x128xf32> to vector<2x8x128xf32>
    %19 = arith.mulf %15, %18 : vector<2x8x128xf32>
    %cst_11 = arith.constant dense<0.000000e+00> : vector<2x8xf32>
    %20 = vector.multi_reduction <add>, %19, %cst_11 [2] : vector<2x8x128xf32> to vector<2x8xf32>
    %c0_12 = arith.constant 0 : index
    %c0_13 = arith.constant 0 : index
    %21 = vector.load %arg5[%c0_12, %c0_13] : memref<2x8xf32, #tpu.memory_space<vmem>>, vector<2x8xf32>
    %cst_14 = arith.constant 5.000000e-01 : f32
    %22 = vector.broadcast %cst_14 : f32 to vector<2x8xf32>
    %23 = arith.cmpf olt, %21, %22 : vector<2x8xf32>
    %cst_15 = arith.constant -1.000000e+10 : f32
    %24 = vector.broadcast %cst_15 : f32 to vector<2x8xf32>
    %25 = arith.select %23, %24, %20 : vector<2x8xi1>, vector<2x8xf32>
    %cst_16 = arith.constant dense<0xFF800000> : vector<2xf32>
    %26 = vector.multi_reduction <maximumf>, %25, %cst_16 [1] : vector<2x8xf32> to vector<2xf32>
    %27 = vector.shape_cast %26 : vector<2xf32> to vector<2x1xf32>
    %28 = vector.broadcast %27 : vector<2x1xf32> to vector<2x8xf32>
    %29 = arith.subf %25, %28 : vector<2x8xf32>
    %30 = math.exp %29 : vector<2x8xf32>
    %cst_17 = arith.constant dense<0.000000e+00> : vector<2xf32>
    %31 = vector.multi_reduction <add>, %30, %cst_17 [1] : vector<2x8xf32> to vector<2xf32>
    %32 = vector.shape_cast %31 : vector<2xf32> to vector<2x1xf32>
    %33 = vector.broadcast %32 : vector<2x1xf32> to vector<2x8xf32>
    %34 = arith.divf %30, %33 : vector<2x8xf32>
    %c0_18 = arith.constant 0 : index
    %c0_19 = arith.constant 0 : index
    %c0_20 = arith.constant 0 : index
    %35 = vector.load %arg3[%c0_18, %c0_19, %c0_20] : memref<2x8x32xf32, #tpu.memory_space<vmem>>, vector<2x8x32xf32>
    %36 = vector.shape_cast %34 : vector<2x8xf32> to vector<2x1x8xf32>
    "tpu.trace_start"() <{level = 10 : i32, message = "bqs,bse->bqe"}> : () -> ()
    %cst_21 = arith.constant dense<0.000000e+00> : vector<2x1x32xf32>
    %37 = tpu.matmul %36, %35, %cst_21 {dimension_numbers = #tpu.dot_dimension_numbers<[2], [1], [1], [2], [0, 0, 0, 1, 1, 2], [0], [0]>} : vector<2x1x8xf32>, vector<2x8x32xf32>, vector<2x1x32xf32> -> vector<2x1x32xf32>
    "tpu.trace_stop"() : () -> ()
    %38 = vector.shape_cast %37 : vector<2x1x32xf32> to vector<2x32xf32>
    %c0_22 = arith.constant 0 : index
    %c0_23 = arith.constant 0 : index
    %c0_24 = arith.constant 0 : index
    %39 = vector.load %arg1[%c0_22, %c0_23, %c0_24] : memref<1x2x96xf32, #tpu.memory_space<vmem>>, vector<1x2x96xf32>
    %40 = vector.shape_cast %39 : vector<1x2x96xf32> to vector<2x96xf32>
    %c0_25 = arith.constant 0 : index
    %c0_26 = arith.constant 0 : index
    %41 = vector.load %arg7[%c0_25, %c0_26] : memref<32x96xf32, #tpu.memory_space<vmem>>, vector<32x96xf32>
    %cst_27 = arith.constant dense<0.000000e+00> : vector<2x96xf32>
    %42 = tpu.matmul %38, %41, %cst_27 {dimension_numbers = #tpu.dot_dimension_numbers<[1], [0], [0], [1], [0, 0, 1, 1], [], []>} : vector<2x32xf32>, vector<32x96xf32>, vector<2x96xf32> -> vector<2x96xf32>
    %43 = arith.addf %40, %42 : vector<2x96xf32>
    %44 = vector.extract_strided_slice %43 {offsets = [0, 0], sizes = [2, 32], strides = [1, 1]} : vector<2x96xf32> to vector<2x32xf32>
    %45 = vector.extract_strided_slice %10 {offsets = [0, 0], sizes = [2, 32], strides = [1, 1]} : vector<2x96xf32> to vector<2x32xf32>
    %46 = arith.addf %44, %45 : vector<2x32xf32>
    %47 = arith.negf %46 : vector<2x32xf32>
    %48 = math.exp %47 : vector<2x32xf32>
    %cst_28 = arith.constant 1.000000e+00 : f32
    %49 = vector.broadcast %cst_28 : f32 to vector<2x32xf32>
    %50 = arith.addf %49, %48 : vector<2x32xf32>
    %51 = arith.divf %49, %50 : vector<2x32xf32>
    %52 = vector.extract_strided_slice %43 {offsets = [0, 32], sizes = [2, 32], strides = [1, 1]} : vector<2x96xf32> to vector<2x32xf32>
    %53 = vector.extract_strided_slice %10 {offsets = [0, 32], sizes = [2, 32], strides = [1, 1]} : vector<2x96xf32> to vector<2x32xf32>
    %54 = arith.addf %52, %53 : vector<2x32xf32>
    %55 = arith.negf %54 : vector<2x32xf32>
    %56 = math.exp %55 : vector<2x32xf32>
    %cst_29 = arith.constant 1.000000e+00 : f32
    %57 = vector.broadcast %cst_29 : f32 to vector<2x32xf32>
    %58 = arith.addf %57, %56 : vector<2x32xf32>
    %59 = arith.divf %57, %58 : vector<2x32xf32>
    %60 = vector.extract_strided_slice %43 {offsets = [0, 64], sizes = [2, 32], strides = [1, 1]} : vector<2x96xf32> to vector<2x32xf32>
    %61 = vector.extract_strided_slice %10 {offsets = [0, 64], sizes = [2, 32], strides = [1, 1]} : vector<2x96xf32> to vector<2x32xf32>
    %62 = arith.mulf %51, %61 : vector<2x32xf32>
    %63 = arith.addf %60, %62 : vector<2x32xf32>
    %64 = math.tanh %63 : vector<2x32xf32>
    %cst_30 = arith.constant 1.000000e+00 : f32
    %65 = vector.broadcast %cst_30 : f32 to vector<2x32xf32>
    %66 = arith.subf %65, %59 : vector<2x32xf32>
    %67 = arith.mulf %66, %64 : vector<2x32xf32>
    %68 = arith.mulf %59, %3 : vector<2x32xf32>
    %69 = arith.addf %67, %68 : vector<2x32xf32>
    %c0_31 = arith.constant 0 : index
    %c0_32 = arith.constant 0 : index
    %70 = vector.load %arg11[%c0_31, %c0_32] : memref<2x32xf32, #tpu.memory_space<vmem>>, vector<2x32xf32>
    tpu.vector_store %arg11[%c0_31, %c0_32], %69 {strides = array<i32>} : memref<2x32xf32, #tpu.memory_space<vmem>>, vector<2x32xf32>,
    %71 = vector.shape_cast %69 : vector<2x32xf32> to vector<1x2x32xf32>
    %72 = arith.index_cast %arg0 : i32 to index
    %c0_33 = arith.constant 0 : index
    %c0_34 = arith.constant 0 : index
    %73 = vector.load %arg10[%72, %c0_33, %c0_34] : memref<4x2x384xf32, #tpu.memory_space<vmem>>, vector<1x2x32xf32>
    tpu.vector_store %arg10[%72, %c0_33, %c0_34], %71 {strides = array<i32>} : memref<4x2x384xf32, #tpu.memory_space<vmem>>, vector<1x2x32xf32>,
    %74 = vector.shape_cast %38 : vector<2x32xf32> to vector<1x2x32xf32>
    %75 = arith.index_cast %arg0 : i32 to index
    %c0_35 = arith.constant 0 : index
    %c128 = arith.constant 128 : index
    %76 = vector.load %arg10[%75, %c0_35, %c128] : memref<4x2x384xf32, #tpu.memory_space<vmem>>, vector<1x2x32xf32>
    tpu.vector_store %arg10[%75, %c0_35, %c128], %74 {strides = array<i32>} : memref<4x2x384xf32, #tpu.memory_space<vmem>>, vector<1x2x32xf32>,
    %77 = vector.shape_cast %34 : vector<2x8xf32> to vector<1x2x8xf32>
    %78 = arith.index_cast %arg0 : i32 to index
    %c0_36 = arith.constant 0 : index
    %c256 = arith.constant 256 : index
    %79 = vector.load %arg10[%78, %c0_36, %c256] : memref<4x2x384xf32, #tpu.memory_space<vmem>>, vector<1x2x8xf32>
    tpu.vector_store %arg10[%78, %c0_36, %c256], %77 {strides = array<i32>} : memref<4x2x384xf32, #tpu.memory_space<vmem>>, vector<1x2x8xf32>,
    return
  }
  func.func @transform_0(%arg0: i32) -> (i32, i32, i32) {
    %c0_i32 = arith.constant 0 : i32
    %c0_i32_0 = arith.constant 0 : i32
    %c0_i32_1 = arith.constant 0 : i32
    return %arg0, %c0_i32, %c0_i32_0 : i32, i32, i32
  }
  func.func @transform_1(%arg0: i32) -> (i32, i32) {
    %c0_i32 = arith.constant 0 : i32
    %c0_i32_0 = arith.constant 0 : i32
    %c0_i32_1 = arith.constant 0 : i32
    return %c0_i32, %c0_i32_0 : i32, i32
  }
  func.func @transform_2(%arg0: i32) -> (i32, i32, i32) {
    %c0_i32 = arith.constant 0 : i32
    %c0_i32_0 = arith.constant 0 : i32
    %c0_i32_1 = arith.constant 0 : i32
    %c0_i32_2 = arith.constant 0 : i32
    return %c0_i32, %c0_i32_0, %c0_i32_1 : i32, i32, i32
  }
  func.func @transform_3(%arg0: i32) -> (i32, i32, i32) {
    %c0_i32 = arith.constant 0 : i32
    %c0_i32_0 = arith.constant 0 : i32
    %c0_i32_1 = arith.constant 0 : i32
    %c0_i32_2 = arith.constant 0 : i32
    return %c0_i32, %c0_i32_0, %c0_i32_1 : i32, i32, i32
  }
  func.func @transform_4(%arg0: i32) -> (i32, i32) {
    %c0_i32 = arith.constant 0 : i32
    %c0_i32_0 = arith.constant 0 : i32
    %c0_i32_1 = arith.constant 0 : i32
    return %c0_i32, %c0_i32_0 : i32, i32
  }
  func.func @transform_5(%arg0: i32) -> (i32, i32) {
    %c0_i32 = arith.constant 0 : i32
    %c0_i32_0 = arith.constant 0 : i32
    %c0_i32_1 = arith.constant 0 : i32
    return %c0_i32, %c0_i32_0 : i32, i32
  }
  func.func @transform_6(%arg0: i32) -> (i32, i32) {
    %c0_i32 = arith.constant 0 : i32
    %c0_i32_0 = arith.constant 0 : i32
    %c0_i32_1 = arith.constant 0 : i32
    return %c0_i32, %c0_i32_0 : i32, i32
  }
  func.func @transform_7(%arg0: i32) -> (i32, i32) {
    %c0_i32 = arith.constant 0 : i32
    %c0_i32_0 = arith.constant 0 : i32
    %c0_i32_1 = arith.constant 0 : i32
    return %c0_i32, %c0_i32_0 : i32, i32
  }
  func.func @transform_8(%arg0: i32) -> (i32, i32) {
    %c0_i32 = arith.constant 0 : i32
    %c0_i32_0 = arith.constant 0 : i32
    %c0_i32_1 = arith.constant 0 : i32
    return %c0_i32, %c0_i32_0 : i32, i32
  }
  func.func @transform_9(%arg0: i32) -> (i32, i32, i32) {
    %c0_i32 = arith.constant 0 : i32
    %c0_i32_0 = arith.constant 0 : i32
    %c0_i32_1 = arith.constant 0 : i32
    %c0_i32_2 = arith.constant 0 : i32
    return %c0_i32, %c0_i32_0, %c0_i32_1 : i32, i32, i32
  }
}

</mosaic_0001>

<bundles_post_ra>
// kernel: tpu_custom_call.1
= control target key start
LH: loop header
LB: loop body
LE: loop exit
PB: predicated region body
PF: predicated region fallthrough
CT: control target
= control target key end

     0   :  { %s1803_s0 = inlined_call_operand.hbm [shape: f32[4,2,96], index: 0, kind: input, shape index: {}]   ;;  %s1804_s1 = inlined_call_operand.vmem [shape: f32[2,32], index: 1, kind: input, shape index: {}]   ;;  %s1805_s2 = inlined_call_operand.hbm [shape: f32[2,8,32], index: 2, kind: input, shape index: {}]   ;;  %s1806_s3 = inlined_call_operand.hbm [shape: f32[2,8,128], index: 3, kind: input, shape index: {}]   ;;  %s1807_s4 = inlined_call_operand.vmem [shape: f32[2,8], index: 4, kind: input, shape index: {}]   ;;  %s1808_s5 = inlined_call_operand.hbm [shape: f32[32,224], index: 5, kind: input, shape index: {}]   ;;  %s1809_s6 = inlined_call_operand.hbm [shape: f32[32,96], index: 6, kind: input, shape index: {}]   ;;  %s1810_s7 = inlined_call_operand.vmem [shape: f32[1,128], index: 7, kind: input, shape index: {}]   ;;  %s1811_s8 = inlined_call_operand.vmem [shape: f32[1,96], index: 8, kind: input, shape index: {}]   ;;  %s1812_s9 = inlined_call_operand.hbm [shape: f32[4,2,384], index: 9, kind: output, shape index: {}]  }
   0x1   :  { %1818 = sst [smem:[#allocation17_spill]] %s1812_s9 }
   0x2   :  { %14 = vsyncpa [#allocation4], 0 }
   0x3   :  { %16 = vsyncpa [#allocation4 + $0x1], 0 }
   0x4   :  { %17 = vsyncpa [#allocation7], 0 }
   0x5   :  { %18 = vsyncpa [#allocation10], 0 }
   0x6   :  { %19 = vsyncpa [#allocation5], 0  ;;  %s1476_s30 = smov 0   ;;  %s1478_s10 = smov 0  }
   0x7   :  { %s1480_s11 = smov 0   ;;  %s1482_s12 = smov 0  }
   0x8 LB: > { %s1407_s13 = smov [#allocation6]   ;;  %s1497_s15 = sadd.s32 4294967295, %s1405_s12   ;;  %s1405_s12 = sphi %s1482_s12, %s1836_s12   ;;  %s1401_s11 = sphi %s1480_s11, %s1835_s11   ;;  %s1397_s10 = sphi %s1478_s10, %s1834_s10   ;;  %s1393_s30 = sphi %s1476_s30, %s1833_s30  }
   0x9   : > { %s260_s14 = sshll.u32 %s1407_s13, 4  ;;  %p1005_p0 = scmp.ge.s32.totalorder %s1405_s12, 1  ;;  %s1503_s14 = int_to_ptr.vmem [resolvable:$true] %s260_s14 }
   0xa   : > { %p1816_p1 = scmp.eq.s32.totalorder %s1497_s15, 0  ;;  %p245_p2 = scmp.lt.s32.totalorder %s1405_s12, 5 }
   0xb   : > { %s1408_s17 = smov [#allocation9]   ;;  %s1409_s20 = smov [#allocation8]  }
   0xc   : > { %p1505_p4 = pnand %p1005_p0, %p245_p2  ;;  %s289_s18 = sshll.u32 %s1408_s17, 4  ;;  %s1517_s18 = int_to_ptr.vmem [resolvable:$true] %s289_s18 }
   0xd   : > { %s1519_s21 = sshll.u32 %s1409_s20, 4  ;;  %s1191_s24 = scalar_lea.hbm %s1805_s2, 256  ;;  %s274_s21 = int_to_ptr.vmem [resolvable:$true] %s1519_s21 }
   0xe   : > { %s1819_s16 = scalar_select %p1505_p4, 1, 0 }
   0xf   : > { %p1099_p5 = pneg %p1505_p4  ;;  %p1192_p7 = scmp.ne.s32.totalorder %s1805_s2, %s1191_s24 }
  0x10   : > { %p1198_p11 = scmp.lt.u32.totalorder %s1191_s24, %s1805_s2 }
  0x11   : > { %p1513_p6 = pnand %p1099_p5, %p1816_p1 }
  0x13   : > { %p1529_p8 = pneg %p1513_p6 }
  0x15   : > { %p1194_p9 = pnand %p1529_p8, %p1192_p7 }
  0x17   : > { %p1195_p10 = pneg %p1194_p9 }
  0x19   : > { %p1200_p12 = pnand %p1198_p11, %p1195_p10 }
  0x1b   : > { %1203 = shalt.err (!%p1200_p12)
}
  0x1c   : > { %s1204_s13 = scalar_lea.vmem %s1503_s14, 256  ;;  %p1212_p5 = scmp.lt.s32.totalorder %s1503_s14, %s1503_s14 }
  0x1d   : > { %p1205_p13 = scmp.ne.s32.totalorder %s1503_s14, %s1204_s13  ;;  %p1213_p3 = scmp.lt.s32.totalorder %s1204_s13, %s1204_s13 }
  0x1f   : > { %p1207_p0 = pnand %p1205_p13, %p1529_p8  ;;  %p1214_p7 = por %p1213_p3, %p1212_p5 }
  0x21   : > { %p1208_p2 = pneg %p1207_p0 }
  0x23   : > { %p1215_p9 = pnand %p1214_p7, %p1208_p2 }
  0x25   : > { %1218 = shalt.err (!%p1215_p9)
}
  0x26   : > { %s1814_s17 = smov 128   ;;  %s1411_s20 = smov 8  }
  0x27   : > { %1102 = dma.hbm_to_vmem [thread:$0]  (!%p1513_p6), %s1805_s2, 256, %s1503_s14, [#allocation7], %s1814_s17, %s1814_s17, %s1411_s20  }
  0x28   : > { %s1219_s26 = scalar_lea.hbm %s1808_s5, 1024 }
  0x29   : > { %p1220_p3 = scmp.ne.s32.totalorder %s1808_s5, %s1219_s26  ;;  %p1226_p12 = scmp.lt.u32.totalorder %s1219_s26, %s1808_s5 }
  0x2b   : > { %p1222_p10 = pnand %p1220_p3, %p1529_p8 }
  0x2d   : > { %p1223_p11 = pneg %p1222_p10 }
  0x2f   : > { %p1228_p13 = pnand %p1226_p12, %p1223_p11 }
  0x31   : > { %1231 = shalt.err (!%p1228_p13)
}
  0x32   : > { %s1232_s14 = scalar_lea.vmem %s1517_s18, 1024  ;;  %p1240_p7 = scmp.lt.s32.totalorder %s1517_s18, %s1517_s18 }
  0x33   : > { %p1233_p0 = scmp.ne.s32.totalorder %s1517_s18, %s1232_s14  ;;  %p1241_p9 = scmp.lt.s32.totalorder %s1232_s14, %s1232_s14 }
  0x35   : > { %p1235_p2 = pnand %p1233_p0, %p1529_p8  ;;  %p1242_p3 = por %p1241_p9, %p1240_p7 }
  0x37   : > { %p1236_p5 = pneg %p1235_p2 }
  0x39   : > { %p1243_p10 = pnand %p1242_p3, %p1236_p5 }
  0x3b   : > { %1246 = shalt.err (!%p1243_p10)
}
  0x3c   : > { %s1412_s22 = smov 256   ;;  %s1413_s9 = smov 16  }
  0x3d   : > { %1108 = dma.hbm_to_vmem [thread:$0]  (!%p1513_p6), %s1808_s5, 1024, %s1517_s18, [#allocation10], %s1412_s22, %s1412_s22, %s1413_s9  }
  0x3e   : > { %s1247_s28 = scalar_lea.hbm %s1806_s3, 256 }
  0x3f   : > { %p1248_p11 = scmp.ne.s32.totalorder %s1806_s3, %s1247_s28  ;;  %p1254_p0 = scmp.lt.u32.totalorder %s1247_s28, %s1806_s3 }
  0x41   : > { %p1250_p12 = pnand %p1248_p11, %p1529_p8 }
  0x43   : > { %p1251_p13 = pneg %p1250_p12 }
  0x45   : > { %p1256_p2 = pnand %p1254_p0, %p1251_p13 }
  0x47   : > { %1259 = shalt.err (!%p1256_p2)
}
  0x48   : > { %s1260_s23 = scalar_lea.vmem %s274_s21, 256  ;;  %p1268_p3 = scmp.lt.s32.totalorder %s274_s21, %s274_s21 }
  0x49   : > { %p1261_p5 = scmp.ne.s32.totalorder %s274_s21, %s1260_s23  ;;  %p1269_p10 = scmp.lt.s32.totalorder %s1260_s23, %s1260_s23 }
  0x4b   : > { %p1263_p7 = pnand %p1261_p5, %p1529_p8  ;;  %p1270_p1 = por %p1269_p10, %p1268_p3 }
  0x4d   : > { %p1264_p9 = pneg %p1263_p7 }
  0x4f   : > { %p1271_p4 = pnand %p1270_p1, %p1264_p9 }
  0x51   : > { %1274 = shalt.err (!%p1271_p4)
}
  0x52   : > { %s1822_s18 = smov 128   ;;  %s1414_s9 = smov [#allocation11]  }
  0x53   : > { %1105 = dma.hbm_to_vmem [thread:$0]  (!%p1513_p6), %s1806_s3, 256, %s274_s21, [#allocation7], %s1822_s18, %s1822_s18, %s1411_s20  }
  0x54   : > { %s302_s24 = sshll.u32 %s1414_s9, 4  ;;  %s1275_s28 = scalar_lea.hbm %s1809_s6, 512  ;;  %s303_s24 = int_to_ptr.vmem [resolvable:$true] %s302_s24 }
  0x55   : > { %p1276_p1 = scmp.ne.s32.totalorder %s1809_s6, %s1275_s28  ;;  %p1282_p12 = scmp.lt.u32.totalorder %s1275_s28, %s1809_s6 }
  0x57   : > { %p1278_p4 = pnand %p1276_p1, %p1529_p8 }
  0x59   : > { %p1279_p11 = pneg %p1278_p4 }
  0x5b   : > { %p1284_p13 = pnand %p1282_p12, %p1279_p11 }
  0x5d   : > { %1287 = shalt.err (!%p1284_p13)
}
  0x5e   : > { %s1288_s21 = scalar_lea.vmem %s303_s24, 512  ;;  %p1296_p7 = scmp.lt.s32.totalorder %s303_s24, %s303_s24 }
  0x5f   : > { %p1289_p0 = scmp.ne.s32.totalorder %s303_s24, %s1288_s21  ;;  %p1297_p9 = scmp.lt.s32.totalorder %s1288_s21, %s1288_s21 }
  0x61   : > { %p1291_p2 = pnand %p1289_p0, %p1529_p8  ;;  %p1298_p3 = por %p1297_p9, %p1296_p7 }
  0x63   : > { %p1292_p5 = pneg %p1291_p2 }
  0x65   : > { %p1299_p10 = pnand %p1298_p3, %p1292_p5 }
  0x67   : > { %1302 = shalt.err (!%p1299_p10)
}
  0x68   : > { %1111 = dma.hbm_to_vmem [thread:$0]  (!%p1513_p6), %s1809_s6, 512, %s303_s24, [#allocation10], %s1822_s18, %s1822_s18, %s1411_s20  }
  0x69   : > { %s1620_s19 = sadd.s32 1, %s1405_s12   ;;  %s32_s27 = sadd.s32 1, %s1401_s11 }
  0x6a   : > { %s29_s9 = ssub.s32 %s1405_s12, %s1620_s19  ;;  %p39_p8 = scmp.ne.s32.totalorder %s1401_s11, %s1397_s10 }
  0x6b   : > { %p30_p1 = scmp.eq.s32.totalorder %s29_s9, 0  ;;  %p40_p4 = scmp.eq.s32.totalorder %s1405_s12, 0 }
  0x6c   : > { %p45_p11 = scmp.ne.s32.totalorder %s1397_s10, %s1393_s30  ;;  %p1120_p12 = scmp.lt.s32.totalorder %s1405_s12, 4 }
  0x6d   : > { %s1632_s25 = scalar_select %p30_p1, %s1401_s11, %s32_s27  }
  0x6e   : > { %p41_p13 = por %p40_p4, %p39_p8  ;;  %p1823_p0 = scmp.eq.s32.totalorder %s1497_s15, 0 }
  0x6f   : > { %s322_s28 = sand.u32 1, %s1401_s11   ;;  %s1012_s20 = sshll.u32 %s1405_s12, 5 }
  0x70   : > { %p1636_p2 = por %p1823_p0, %p45_p11  ;;  %s1011_s18 = sshll.u32 %s322_s28, 1 }
  0x71   : > { %s1645_s13 = scalar_lea.hbm %s1803_s0, %s1012_s20  ;;  %s326_s30 = scalar_lea.vmem [#allocation3], %s1011_s18 }
  0x72   : > { %s333_s14 = sshll.u32 %s326_s30, 4  ;;  %p1647_p6 = pnand %p1120_p12, %p41_p13  ;;  %s1651_s14 = int_to_ptr.vmem [resolvable:$true] %s333_s14 }
  0x73   : > { %s323_s12 = scalar_lea.sflag [#allocation4], %s322_s28  ;;  %s1303_s21 = scalar_lea.hbm %s1645_s13, 32 }
  0x74   : > { %p1304_p5 = scmp.ne.s32.totalorder %s1645_s13, %s1303_s21  ;;  %p1305_p7 = pneg %p1647_p6 }
  0x75   : > { %s1308_s27 = scalar_lea.hbm %s1803_s0, 128  ;;  %p1309_p10 = scmp.lt.u32.totalorder %s1645_s13, %s1803_s0 }
  0x76   : > { %p1306_p9 = pnand %p1305_p7, %p1304_p5  ;;  %p1310_p8 = scmp.lt.u32.totalorder %s1308_s27, %s1303_s21 }
  0x77   : > { %p1312_p4 = scmp.lt.u32.totalorder %s1303_s21, %s1645_s13 }
  0x78   : > { %p1307_p3 = pneg %p1306_p9  ;;  %p1311_p1 = por %p1310_p8, %p1309_p10 }
  0x7a   : > { %p1313_p11 = por %p1312_p4, %p1311_p1 }
  0x7c   : > { %p1314_p12 = pnand %p1313_p11, %p1307_p3 }
  0x7e   : > { %1317 = shalt.err (!%p1314_p12)
}
  0x7f   : > { %s1318_s28 = scalar_lea.vmem %s1651_s14, 32  ;;  %s1415_s18 = smov [#allocation3]  }
  0x80   : > { %p1319_p13 = scmp.ne.s32.totalorder %s1651_s14, %s1318_s28  ;;  %s1323_s24 = sshll.u32 %s1415_s18, 4  ;;  %s1324_s24 = int_to_ptr.vmem [resolvable:$false] %s1323_s24 }
  0x81   : > { %s1325_s29 = scalar_lea.vmem %s1324_s24, 64  ;;  %p1326_p9 = scmp.lt.s32.totalorder %s1651_s14, %s1324_s24 }
  0x82   : > { %p1321_p0 = pnand %p1319_p13, %p1305_p7  ;;  %p1327_p10 = scmp.lt.s32.totalorder %s1325_s29, %s1318_s28 }
  0x84   : > { %p1322_p5 = pneg %p1321_p0  ;;  %p1328_p8 = por %p1327_p10, %p1326_p9 }
  0x86   : > { %p1329_p1 = pnand %p1328_p8, %p1322_p5 }
  0x88   : > { %1332 = shalt.err (!%p1329_p1)
}
  0x89   : > { %1115 = dma.hbm_to_vmem [thread:$0]  (!%p1647_p6), %s1645_s13, 32, %s1651_s14, %s323_s12  }
  0x8a   : > { %p1826_p3 = scmp.ne.s32.totalorder %s1819_s16, 0 }
  0x8b   : > { %s344_s30 = sand.u32 (!%p1826_p3), 1, %s1397_s10  }
  0x8c   : > { %342 = sbr.rel (%p1826_p3) target bundleno = 1727 (0x6bf), region = 56  ;;  %s1681_s21 = sshll.u32 (!%p1826_p3), %s344_s30, 1 }
  0x8d   : > { %s345_s17 = scalar_lea.sflag (!%p1826_p3), [#allocation4], %s344_s30  ;;  %s348_s22 = scalar_lea.vmem (!%p1826_p3), [#allocation3], %s1681_s21 }
  0x93   : > { %1376 = dma.done.wait (%p1636_p2), %s345_s17, 32  }
  0x94   : > { %1378 = vsyncadd (%p1636_p2), %s345_s17, 4294967264  ;;  %p1827_p7 = scmp.eq.s32.totalorder %s1497_s15, 0 }
  0x96   : > { %1380 = dma.done.wait (%p1827_p7), [#allocation7], 512   ;;  %p1828_p6 = pmov %p1827_p7 }
  0x98   : > { %1382 = vsyncadd (%p1828_p6), [#allocation7], 4294966784  ;;  %p1829_p4 = pmov %p1828_p6 }
  0x9a   : > { %1384 = dma.done.wait (%p1829_p4), [#allocation10], 1536   ;;  %p1830_p11 = pmov %p1829_p4 }
  0x9b   : > { %p1831_p12 = scmp.ne.s32.totalorder %s1497_s15, 0 }
  0x9c   : > { %1386 = vsyncadd (%p1830_p11), [#allocation10], 4294965760  ;;  %v398_v0 = vld [vmem:[%s1804_s1] sm:$0x3] (!%p1831_p12)  ;;  %vm399_vm0 = vcmask (!%p1831_p12), 254976  }
  0x9d   : > { %397 = sbr.rel (%p1831_p12) target bundleno = 164 (0xa4), region = 80  ;;  %400 = vst.msk [vmem:[#allocation2] sm:$0x3] (!%p1831_p12), %vm399_vm0, %v398_v0 }
  0xa4 PF: > { %v403_v1 = vld [vmem:[#allocation9 + $0x8] sm:$0xff]  ;;  %v405_v2 = vld [vmem:[#allocation9 + $0x18] sm:$0xff]  ;;  %v402_v3 = vld [vmem:[#allocation9] sm:$0xff]  ;;  %v1416_v8 = vmov 0.0   ;;  %vm410_vm1 = vcmask 261120   ;;  %v499_v17 = vlaneseq  ;;  %s1418_s27 = smov 64  }
  0xa5   : > { %v1063_v4 = vpack.c.bf16 %v405_v2, %v403_v1  ;;  %v404_v5 = vld [vmem:[#allocation9 + $0x10] sm:$0xff]  ;;  %v407_v6 = vld [vmem:[#allocation9 + $0x28] sm:$0xff]  ;;  %v409_v7 = vld [vmem:[#allocation9 + $0x38] sm:$0xff]  ;;  %478 = vmatprep.mubr.f32.mxu0 %v1416_v8  ;;  %1047 = vmatprep.subr.mxu1 %v1416_v8  ;;  %v1417_v15 = vmov 1966171168   ;;  %vm559_vm2 = vcmask 1041409  }
  0xa6   : > { %v1065_v9 = vpack.c.bf16 %v404_v5, %v402_v3  ;;  %v1067_v10 = vpack.c.bf16 %v409_v7, %v407_v6  ;;  %v406_v11 = vld [vmem:[#allocation9 + $0x20] sm:$0xff]  ;;  %v408_v12 = vld [vmem:[#allocation9 + $0x30] sm:$0xff]  ;;  %v1703_v14 = vld [vmem:[#allocation2] sm:$0x3]  ;;  %v497_v16 = vunpack.c.l.s4 %v1417_v15  ;;  %v1708_v19 = vshrl.u32 %v499_v17, 7  ;;  %s1032_s28 = smul.u32 6, %s1497_s15 }
  0xa7   : > { %1064 = vmatprep.subr.bf16.mxu0 %v1063_v4  ;;  %v1069_v13 = vpack.c.bf16 %v408_v12, %v406_v11  ;;  %v493_v27 = vld [vmem:[#allocation8] sm:$0xff]  ;;  %v494_v30 = vld [vmem:[#allocation8 + $0x8] sm:$0xff]  ;;  %v550_v41 = vand.u32 127, %v499_v17  ;;  %vm563_vm4 = vcmask 58368   ;;  %v575_v56 = vld [vmem:[#allocation6] sm:$0xff]  ;;  %vm1419_vm5 = vmmov 0  }
  0xa8   : > { %1066 = vmatpush1.bf16.msra.mxu0 %v1065_v9  ;;  %v498_v18 = vunpack.c.0.s8 %v497_v16  ;;  %v520_v23 = vsub.s32 0, %v1708_v19  ;;  %v1022_v34 = vld [vmem:[%s1810_s7] ss:$0 sm:$0xff]  ;;  %1049 = vmatprep.mubr.msk.f32.mxu1 %vm1419_vm5, %v1416_v8  ;;  %v576_v57 = vld [vmem:[#allocation6 + $0x8] sm:$0xff]  ;;  %v1420_v58 = vmov 0.0|0.0   ;;  %v746_v63 = vld [vmem:[#allocation11] sm:$0xff] }
  0xa9   : > { %1068 = vmatprep.subr.bf16.mxu0 %v1067_v10  ;;  %v1021_v39 = vld [vmem:[%s1811_s8] ss:$0 sm:$0xff]  ;;  %v553_v43 = vsub.s32 %v550_v41, %v1708_v19  ;;  %1048 = vmatpush3.msra.mxu1 %v576_v57  ;;  %v747_v0 = vld [vmem:[#allocation11 + $0x8] sm:$0xff]  ;;  %s1740_s18 = scalar_lea.vmem [#allocation12], %s1032_s28  ;;  %vm600_vm6 = vcmask 64512   ;;  %v748_v5 = vld [vmem:[#allocation11 + $0x10] sm:$0xff] }
  0xaa   : > { %v1711_v20 = vsub.s32 %v498_v18, %v1708_v19  ;;  %v545_v44 = vld [vmem:[%s1807_s4] sm:$0x3]  ;;  %1071 = vmatprep.subr.bf16.mxu1 %v1420_v58  ;;  %v1072_v3 = vpack.c.bf16 %v747_v0, %v746_v63  ;;  %v1421_v9 = vmov 1983009808   ;;  %vm896_vm7 = vcmask 1043459   ;;  %s1422_s24 = smov 96  }
  0xab   : > { %vm546_vm3 = vcmp.lt.f32.partialorder %v545_v44, 0.5  ;;  %v749_v6 = vld [vmem:[#allocation11 + $0x18] sm:$0xff]  ;;  %v863_v10 = vunpack.c.l.s4 %v1421_v9  ;;  %vm898_vm8 = vcmask 1045509   ;;  %vm900_vm9 = vcmask 1047559   ;;  %s1423_s29 = smov 32   ;;  %s1424_s30 = smov [#allocation12]  }
  0xac   : > { %1070 = vmatpush1.bf16.msra.mxu0 %v1069_v13  ;;  %v1075_v7 = vpack.c.bf16 %v749_v6, %v748_v5  ;;  %vm860_vm10 = vcmask 254976   ;;  %s911_s21 = sshll.u32 %s1424_s30, 4  ;;  %p1125_p2 = scmp.eq.s32.totalorder %s1497_s15, 3  ;;  %s912_s21 = int_to_ptr.vmem [resolvable:$true] %s911_s21 }
  0xad   : > { %1042 = vmatprep.subr.mxu0 %v1416_v8  ;;  %v864_v11 = vunpack.c.0.s8 %v863_v10  ;;  %s1333_s17 = scalar_lea.vmem %s912_s21, 384  ;;  %p1340_p9 = scmp.lt.s32.totalorder %s912_s21, %s912_s21 }
  0xae   : > { %p1334_p13 = scmp.ne.s32.totalorder %s912_s21, %s1333_s17  ;;  %p1341_p10 = scmp.lt.s32.totalorder %s1333_s17, %s1333_s17 }
  0xaf   : > { %1020 = vmatmul.mubr.msk.f32.vlgmr.msra.gmra.mrb[0].mxu0 %vm410_vm1, %v1703_v14  ;;  %v867_v13 = vsub.s32 %v864_v11, %v1708_v19 }
  0xb0   : > { %1043 = vmatpush3.msra.mxu0 %v575_v56  ;;  %1044 = vmatprep.mubr.msk.f32.mxu0 %vm1419_vm5, %v1416_v8  ;;  %p1335_p0 = pnand %p1334_p13, %p1125_p2  ;;  %p1342_p8 = por %p1341_p10, %p1340_p9 }
  0xb2   : > { %p1336_p5 = pneg %p1335_p0 }
  0xb4   : > { %p1343_p1 = pnand %p1342_p8, %p1336_p5 }
 0x182   : > { %v480_v21 = vpop.f32.mrb[0].mxu0 }
 0x183   : > { %v502_v22 = vrot.slane %v480_v21, %v1711_v20  ;;  %v482_v24 = vpop.f32.mrb[1].mxu0 }
 0x184   : > { %v1723_v40 = vadd.f32 %v1021_v39, %v482_v24 }
 0x185   : > { %v503_v25 = vcombine.high %v502_v22, %v502_v22  ;;  %v510_v26 = vrot.slane %v502_v22, %v1711_v20 }
 0x187   : > { %v517_v28 = vrot.slane %v503_v25, %v1711_v20  ;;  %v521_v29 = vrot.slane %v510_v26, %v520_v23  ;;  %v745_v26 = vld [vmem:[%s348_s22] sm:$0x3] }
 0x189   : > { %v525_v31 = vrot.slane %v517_v28, %v520_v23  ;;  %v528_v32 = vadd.f32 %v521_v29, %v493_v27 }
 0x18b   : > { %v529_v33 = vadd.f32 %v525_v31, %v494_v30  ;;  %1177 = vtanh.f32 %v528_v32 }
 0x18d   : > { %1179 = vtanh.f32 %v529_v33 }
 0x195   : > { %v1178_v35 = vpop.eup %1177 }
 0x196   : > { %v539_v36 = vmul.f32 %v1178_v35, %v1022_v34 }
 0x197   : > { %v1180_v37 = vpop.eup %1179 }
 0x198   : > { %541 = vadd.xlane.f32.xlu0 %v539_v36  ;;  %v540_v38 = vmul.f32 %v1180_v37, %v1022_v34 }
 0x19c   : > { %543 = vadd.xlane.f32.xlu0 %v540_v38 }
 0x1b2   : > { %835 = vrot.lane.b32.xlu0 %v1723_v40, %s1418_s27 }
 0x225   : > { %v542_v42 = vpop.xlane.xlu0 %541 }
 0x226   : > { %v554_v46 = vrot.slane %v542_v42, %v553_v43 }
 0x229   : > { %v544_v45 = vpop.xlane.xlu0 %543 }
 0x22a   : > { %v558_v47 = vrot.slane %v544_v45, %v553_v43 }
 0x22c   : > { %v560_v48 = vsel %vm559_vm2, %v558_v47, %v554_v46 }
 0x22d   : > { %v562_v49 = vsel %vm546_vm3, -1e+10, %v560_v48  ;;  %v836_v35 = vpop.permute.xlu0 %835 }
 0x22e   : > { %v564_v50 = vsel %vm563_vm4, %v562_v49, -inf }
 0x22f   : > { %565 = vmax.xlane.f32.xlu1 %v564_v50 }
 0x2bc   : > { %v566_v51 = vpop.xlane.xlu1 %565 }
 0x2bd   : > { %v567_v52 = vsub.f32 %v562_v49, %v566_v51 }
 0x2bf   : > { %v568_v53 = vmul.f32 1.442695, %v567_v52 }
 0x2c1   : > { %1181 = vpow2.f32 %v568_v53 }
 0x2cb   : > { %v1182_v54 = vpop.eup %1181 }
 0x2cc   : > { %v570_v55 = vsel %vm563_vm4, %v1182_v54, 0.0 }
 0x2cd   : > { %571 = vadd.xlane.f32.xlu1 %v570_v55 }
 0x35a   : > { %v572_v59 = vpop.xlane.xlu1 %571 }
 0x35b   : > { %1183 = vrcp.f32 %v572_v59 }
 0x365   : > { %v1184_v60 = vpop.eup %1183 }
 0x366   : > { %v574_v61 = vmul.f32 %v1184_v60, %v1182_v54 }
 0x368   : > { %v584_v62 = vrot.slane %v574_v61, %v1711_v20  ;;  %904 = vst.msk [vmem:[%s1740_s18 + $0x4] sm:$0x3] %vm563_vm4, %v574_v61 }
 0x36a   : > { %v592_v1 = vrot.slane %v584_v62, %v1711_v20  ;;  %v585_v2 = vcombine.high %v584_v62, %v584_v62 }
 0x36c   : > { %1045 = vmatmul.mubr.msk.f32.vlgmr.msra.gmra.mrb[2].mxu0 %vm600_vm6, %v592_v1  ;;  %v599_v4 = vrot.slane %v585_v2, %v1711_v20 }
 0x36e   : > { %1050 = vmatmul.mubr.msk.f32.vlgmr.msra.gmra.mrb[0].mxu1 %vm600_vm6, %v599_v4 }
 0x36f   : > { %1073 = vmatpush3.bf16.msra.mxu1 %v1072_v3  ;;  %1060 = vmatprep.mubr.msk.f32.mxu1 %vm1419_vm5, %v1416_v8 }
 0x370   : > { %1074 = vmatprep.subr.bf16.mxu1 %v1420_v58 }
 0x373   : > { %1076 = vmatpush3.bf16.msra.mxu1 %v1075_v7 }
 0x43f   : > { %v669_v12 = vpop.f32.mrb[2].mxu0 }
 0x440   : > { %v1046_v15 = vpop.f32.mrb[3].mxu0  ;;  %v882_v21 = vrot.slane %v669_v12, %v867_v13 }
 0x441   : > { %v741_v16 = vpop.f32.mrb[0].mxu1 }
 0x442   : > { %v752_v17 = vrot.slane %v741_v16, 7  ;;  %v889_v18 = vrot.slane %v741_v16, %v867_v13  ;;  %v1051_v20 = vpop.f32.mrb[1].mxu1 }
 0x444   : > { %v894_v8 = vrot.slane %v889_v18, 7  ;;  %v753_v22 = vsel %vm559_vm2, %v752_v17, %v669_v12 }
 0x445   : > { %1061 = vmatmul.mubr.msk.f32.vlgmr.msra.gmra.mrb[2].mxu1 %vm410_vm1, %v753_v22 }
 0x446   : > { %v895_v23 = vsel %vm559_vm2, %v894_v8, %v882_v21 }
 0x447   : > { %v897_v24 = vsel %vm896_vm7, %v894_v8, %v895_v23 }
 0x448   : > { %v899_v19 = vsel %vm898_vm8, %v894_v8, %v897_v24 }
 0x449   : > { %v901_v25 = vsel %vm900_vm9, %v894_v8, %v899_v19 }
 0x44a   : > { %903 = vst.msk [vmem:[%s1740_s18 + $0x2] sm:$0x3] %vm860_vm10, %v901_v25 }
 0x518   : > { %v822_v27 = vpop.f32.mrb[2].mxu1 }
 0x519   : > { %v826_v28 = vadd.f32 %v822_v27, %v745_v26  ;;  %v1062_v29 = vpop.f32.mrb[3].mxu1 }
 0x51b   : > { %v827_v30 = vadd.f32 %v826_v28, %v1723_v40 }
 0x51d   : > { %v1026_v31 = vmul.f32 -1.442695, %v827_v30 }
 0x51f   : > { %1185 = vpow2.f32 %v1026_v31 }
 0x529   : > { %v1186_v32 = vpop.eup %1185 }
 0x52a   : > { %v831_v33 = vadd.f32 1.0, %v1186_v32 }
 0x52c   : > { %1187 = vrcp.f32 %v831_v33 }
 0x536   : > { %v1188_v34 = vpop.eup %1187 }
 0x537   : > { %v838_v36 = vmul.f32 %v1188_v34, %v836_v35  ;;  %v845_v41 = vsub.f32 1.0, %v1188_v34 }
 0x539   : > { %840 = vrot.lane.b32.xlu1 %v838_v36, %s1418_s27 }
 0x5ab   : > { %v841_v37 = vpop.permute.xlu1 %840 }
 0x5ac   : > { %v843_v38 = vadd.f32 %v841_v37, %v826_v28 }
 0x5ae   : > { %1189 = vtanh.f32 %v843_v38 }
 0x5b8   : > { %v1190_v39 = vpop.eup %1189 }
 0x5b9   : > { %847 = vrot.lane.b32.xlu1 %v1190_v39, %s1422_s24 }
 0x5bd   : > { %851 = vrot.lane.b32.xlu1 %v1703_v14, %s1423_s29 }
 0x62b   : > { %v848_v40 = vpop.permute.xlu1 %847 }
 0x62c   : > { %v850_v43 = vmul.f32 %v848_v40, %v845_v41 }
 0x62f   : > { %v852_v42 = vpop.permute.xlu1 %851 }
 0x630   : > { %v854_v44 = vmul.f32 %v1188_v34, %v852_v42 }
 0x632   : > { %v855_v45 = vadd.f32 %v854_v44, %v850_v43 }
 0x634   : > { %857 = vrot.lane.b32.xlu1 %v855_v45, %s1422_s24  ;;  %v868_v46 = vrot.slane %v855_v45, %v867_v13 }
 0x636   : > { %869 = vrot.lane.b32.xlu0 %v868_v46, %s1422_s24 }
 0x6a6   : > { %v858_v47 = vpop.permute.xlu1 %857 }
 0x6a7   : > { %861 = vst.msk [vmem:[#allocation2] sm:$0x3] %vm860_vm10, %v858_v47 }
 0x6a8   : > { %v870_v14 = vpop.permute.xlu0 %869 }
 0x6a9   : > { %875 = vst.msk [vmem:[%s1740_s18] sm:$0x3] %vm860_vm10, %v870_v14 }
 0x6aa   : > { %1346 = shalt.err (!%p1343_p1)
}
 0x6ab   : > { %s1832_s13 = sld [smem:[#allocation17_spill]] }
 0x6b1   : > { %s1347_s26 = scalar_lea.hbm %s1832_s13, 384 }
 0x6b2   : > { %p1348_p3 = scmp.ne.s32.totalorder %s1832_s13, %s1347_s26  ;;  %p1353_p4 = scmp.lt.u32.totalorder %s1347_s26, %s1832_s13 }
 0x6b4   : > { %p1349_p7 = pnand %p1348_p3, %p1125_p2 }
 0x6b6   : > { %p1350_p6 = pneg %p1349_p7 }
 0x6b8   : > { %p1355_p11 = pnand %p1353_p4, %p1350_p6 }
 0x6ba   : > { %1358 = shalt.err (!%p1355_p11)
}
 0x6bb   : > { %s1425_s9 = smov 6  }
 0x6bc   : > { %1096 = dma.vmem_to_hbm [thread:$0]  (%p1125_p2), %s912_s21, 384, %s1832_s13, [#allocation5], %s1422_s24, %s1422_s24, %s1425_s9  }
 0x6bd   : > { %1388 = dma.done.wait (%p1125_p2), [#allocation5], 384  }
 0x6be   : > { %1390 = vsyncadd (%p1125_p2), [#allocation5], 4294966912 }
 0x6bf PF: > { %p22_p12 = scmp.ge.s32.totalorder %s1620_s19, 6   ;;  %s1833_s30 = smov %s1397_s10 }
 0x6c0   : > { %s1834_s10 = smov %s1401_s11  ;;  %s1835_s11 = smov %s1632_s25 }
 0x6c1   : > { %s1836_s12 = smov %s1620_s19  ;;  %24 = sbr.rel (!%p22_p12) target bundleno = 8 (0x8), region = 114 }
 0x6c8   :  { %927 = vsyncpa [#allocation4], 1 }
 0x6c9   :  { %929 = vsyncpa [#allocation4 + $0x1], 1 }
 0x6ca   :  { %930 = vsyncpa [#allocation7], 1 }
 0x6cb   :  { %931 = vsyncpa [#allocation10], 1 }
 0x6cc   :  { %932 = vsyncpa [#allocation5], 1 }
 0x6cd   :  { %934 = vsyncpa [#allocation5 + $0x1], 1 }

</bundles_post_ra>
